<compile_context>
chip_gen: v7x
topology: tpu7x:2x2x1
jax: 0.10.0
libtpu: 0.0.40
codegen_flags: <defaults>
</compile_context>

<pallas_src>
import functools
import math

import jax
import jax.numpy as jnp
from jax.experimental import pallas as pl
from jax.experimental.pallas import tpu as pltpu


def _round_up(x, m):
    return ((x + m - 1) // m) * m


def _logdet_kernel(probs_ref, tgt_ref, out_ref, *, num_models, num_classes,
                   det_offset, chunk):
    """One grid step: per-example logdet over a [tb]-wide batch tile.

    probs_ref: [tb, M*C]  natural layout (batch on sublanes), any float dtype
    tgt_ref:   [1, tb]    int32 targets (batch on lanes)
    out_ref:   [1, tb]    f32 per-example logdet (lane-dense)
    """
    M, C = num_models, num_classes
    tb = out_ref.shape[-1]
    nchunks = tb // chunk
    delta = 1.0 + det_offset          # exact diagonal of the normalized Gram

    def process(start):
        # Load a [chunk, M*C] slab and relayout in-kernel to batch-on-lanes
        # (single XLU transpose; replaces the old wrapper-side transpose+pad,
        # so probs is read from HBM exactly once).
        p = probs_ref[pl.ds(start, chunk), :].astype(jnp.float32)   # [chunk, M*C]
        q = jnp.transpose(p)                                        # [M*C, chunk]
        tgt = tgt_ref[:, pl.ds(start, chunk)]                       # [1, chunk]

        # Non-target-class mask; zeroing the target column is equivalent to
        # masked_select for every norm / dot product below.
        cls = jax.lax.broadcasted_iota(jnp.int32, (C, chunk), 0)
        keep = (cls != tgt).astype(jnp.float32)                     # [C, chunk]

        rows = [q[m * C:(m + 1) * C, :] * keep for m in range(M)]   # [C, chunk]

        def dot(i, j):
            # Tiny class axis on sublanes -> single sublane-tree reduce.
            return jnp.sum(rows[i] * rows[j], axis=0, keepdims=True)  # [1, chunk]

        if M == 1:
            ld = jnp.full((1, chunk), math.log(delta), jnp.float32)
        elif M == 2:
            g00, g11, g01 = dot(0, 0), dot(1, 1), dot(0, 1)
            prod = g00 * g11
            ld = jnp.log((delta * delta) * prod - g01 * g01) - jnp.log(prod)
        elif M == 3:
            # Closed-form 3x3 SPD logdet of the normalized Gram + offset,
            # without ever normalizing:
            #   N_ij = G_ij / sqrt(G_ii G_jj) (i != j),  N_ii = delta
            #   det(N) * (G00 G11 G22) =
            #     delta^3 * P + 2*G01*G02*G12
            #     - delta*(G01^2*G22 + G02^2*G11 + G12^2*G00)
            g00, g11, g22 = dot(0, 0), dot(1, 1), dot(2, 2)
            g01, g02, g12 = dot(0, 1), dot(0, 2), dot(1, 2)
            prod = g00 * g11 * g22
            t3 = g01 * g02 * g12
            s3 = g01 * g01 * g22 + g02 * g02 * g11 + g12 * g12 * g00
            num = (delta ** 3) * prod + 2.0 * t3 - delta * s3
            ld = jnp.log(num) - jnp.log(prod)
        else:
            # General M: normalized Gram + unrolled LDL^T (SPD, no sqrt),
            # with a single folded log of prod_j d_j.
            dn = [dot(i, i) for i in range(M)]
            inv = [jax.lax.rsqrt(dn[i]) for i in range(M)]
            gram = [[None] * M for _ in range(M)]
            for i in range(M):
                for j in range(i + 1, M):
                    g = dot(i, j) * (inv[i] * inv[j])
                    gram[i][j] = g
                    gram[j][i] = g
            L = [[None] * M for _ in range(M)]
            d = [None] * M
            dprod = None
            for j in range(M):
                s = jnp.full((1, chunk), delta, jnp.float32)
                for k in range(j):
                    s = s - (L[j][k] * L[j][k]) * d[k]
                d[j] = s
                dprod = s if dprod is None else dprod * s
                inv_dj = pl.reciprocal(s)
                for i in range(j + 1, M):
                    t = gram[i][j]
                    for k in range(j):
                        t = t - L[i][k] * L[j][k] * d[k]
                    L[i][j] = t * inv_dj
            ld = jnp.log(dprod)

        out_ref[:, pl.ds(start, chunk)] = ld

    if nchunks == 1:
        process(0)
    else:
        def body(k, carry):
            process(pl.multiple_of(k * chunk, chunk))
            return carry
        jax.lax.fori_loop(0, nchunks, body, 0)


def logdet_forward(probs, targets, num_models, num_classes, det_offset=1e-6,
                   block_b=16384):
    """probs: [B, num_models*num_classes] float, targets: [B] int. Returns scalar."""
    B, MC = probs.shape
    assert MC == num_models * num_classes, (probs.shape, num_models, num_classes)

    CHUNK = 256            # in-kernel batch chunk: bounds live vregs (no spills)
    MAX_TB = 32768         # probs block <= ~3.9 MB/buffer: fits default VMEM limits
                           # on v5e/v6e/v7x with double-buffering.

    if B <= 2 * CHUNK:
        tb = _round_up(B, CHUNK)      # tiny batch: a single (partial) tile
    else:
        # Keep >= 2 tiles so v7x's second TensorCore gets work, tiles as big
        # as allowed otherwise.
        tb = min(block_b, _round_up(pl.cdiv(B, 2), CHUNK))
    tb = max(CHUNK, min(_round_up(tb, CHUNK), MAX_TB))
    num_tiles = pl.cdiv(B, tb)

    tgt = jnp.reshape(jnp.asarray(targets), (1, B)).astype(jnp.int32)  # free reshape

    kernel = functools.partial(
        _logdet_kernel, num_models=num_models, num_classes=num_classes,
        det_offset=det_offset, chunk=CHUNK)

    per_example = pl.pallas_call(
        kernel,
        out_shape=jax.ShapeDtypeStruct((1, B), jnp.float32),
        grid=(num_tiles,),
        in_specs=[
            # Natural [B, M*C] layout: one contiguous DMA per batch tile,
            # partial edge blocks handle B % tb != 0 (no wrapper pad).
            pl.BlockSpec((tb, MC), lambda i: (i, 0)),
            pl.BlockSpec((1, tb), lambda i: (0, i)),
        ],
        out_specs=pl.BlockSpec((1, tb), lambda i: (0, i)),
        compiler_params=pltpu.CompilerParams(
            dimension_semantics=("parallel",)),       # batch tiles independent
    )(jnp.asarray(probs), tgt)

    # Per-example logdets (exactly B valid lanes); trivial final mean in JAX.
    return jnp.mean(per_example)


def logdet_reference(probs, targets, num_models, num_classes, det_offset=1e-6):
    """Pure-JAX reference mirroring the PyTorch forward."""
    B = probs.shape[0]
    M, C = num_models, num_classes
    oh = jax.nn.one_hot(targets, C, dtype=jnp.float32)
    keep = 1.0 - jnp.tile(oh, (1, M))                  # == (concat_onehot < 1)
    masked = (probs * keep).reshape(B, M, C)
    normed = masked / jnp.linalg.norm(masked, axis=-1, keepdims=True)
    gram = jnp.einsum('bic,bjc->bij', normed, normed) + det_offset * jnp.eye(M)
    _, ld = jnp.linalg.slogdet(gram)
    return jnp.mean(ld)


if __name__ == "__main__":
    NUM_MODELS, NUM_CLASSES = 3, 10

    def make_inputs(key, b):
        k1, k2 = jax.random.split(key)
        logits = jax.random.normal(k1, (b, NUM_MODELS, NUM_CLASSES), jnp.float32)
        probs = jax.nn.softmax(logits, axis=-1).reshape(
            b, NUM_MODELS * NUM_CLASSES)
        targets = jax.random.randint(k2, (b,), 0, NUM_CLASSES, dtype=jnp.int32)
        return probs, targets

    # Small single-tile case (block larger than the batch -> partial block).
    probs, targets = make_inputs(jax.random.PRNGKey(0), 8)
    out = jax.block_until_ready(
        logdet_forward(probs, targets, NUM_MODELS, NUM_CLASSES, 1e-6))
    ref = logdet_reference(probs, targets, NUM_MODELS, NUM_CLASSES, 1e-6)
    assert abs(float(out) - float(ref)) < 1e-3, (float(out), float(ref))

    # Multi-tile case: 3 grid tiles, partial final block, in-kernel chunking.
    probs2, targets2 = make_inputs(jax.random.PRNGKey(1), 1200)
    out2 = jax.block_until_ready(
        logdet_forward(probs2, targets2, NUM_MODELS, NUM_CLASSES, 1e-6,
                       block_b=512))
    ref2 = logdet_reference(probs2, targets2, NUM_MODELS, NUM_CLASSES, 1e-6)
    assert abs(float(out2) - float(ref2)) < 1e-3, (float(out2), float(ref2))

    print("KERNEL_OK")
</pallas_src>

<mosaic_0001>
module attributes {stable_mosaic.version = 11 : i64} {
  func.func @_logdet_kernel(%arg0: i32, %arg1: memref<256x30xf32, #tpu.memory_space<vmem>>, %arg2: memref<1x256xi32, #tpu.memory_space<vmem>>, %arg3: memref<1x256xf32, #tpu.memory_space<vmem>>) attributes {dimension_semantics = [#tpu.dimension_semantics<parallel>], iteration_bounds = array<i64: 1>, scalar_prefetch = 0 : i64, scratch_operands = 0 : i64, tpu.core_type = #tpu.core_type<tc>, window_params = [{transform_indices = @transform_0, window_bounds = array<i64: 256, 30>}, {transform_indices = @transform_1, window_bounds = array<i64: 1, 256>}, {transform_indices = @transform_2, window_bounds = array<i64: 1, 256>}]} {
    %c0 = arith.constant 0 : index
    %c0_0 = arith.constant 0 : index
    %0 = vector.load %arg1[%c0, %c0_0] : memref<256x30xf32, #tpu.memory_space<vmem>>, vector<256x30xf32>
    %1 = tpu.transpose %0, [1, 0] : vector<256x30xf32> -> vector<30x256xf32>
    %c0_1 = arith.constant 0 : index
    %c0_2 = arith.constant 0 : index
    %2 = vector.load %arg2[%c0_1, %c0_2] : memref<1x256xi32, #tpu.memory_space<vmem>>, vector<1x256xi32>
    %3 = tpu.iota {dimensions = array<i32: 0>} : vector<10x256xi32>
    %4 = vector.broadcast %2 : vector<1x256xi32> to vector<10x256xi32>
    %5 = arith.cmpi ne, %3, %4 : vector<10x256xi32>
    %6 = arith.extui %5 : vector<10x256xi1> to vector<10x256xi32>
    %7 = arith.sitofp %6 : vector<10x256xi32> to vector<10x256xf32>
    %8 = vector.extract_strided_slice %1 {offsets = [0, 0], sizes = [10, 256], strides = [1, 1]} : vector<30x256xf32> to vector<10x256xf32>
    %9 = arith.mulf %8, %7 : vector<10x256xf32>
    %10 = vector.extract_strided_slice %1 {offsets = [10, 0], sizes = [10, 256], strides = [1, 1]} : vector<30x256xf32> to vector<10x256xf32>
    %11 = arith.mulf %10, %7 : vector<10x256xf32>
    %12 = vector.extract_strided_slice %1 {offsets = [20, 0], sizes = [10, 256], strides = [1, 1]} : vector<30x256xf32> to vector<10x256xf32>
    %13 = arith.mulf %12, %7 : vector<10x256xf32>
    %14 = arith.mulf %9, %9 : vector<10x256xf32>
    %cst = arith.constant dense<0.000000e+00> : vector<256xf32>
    %15 = vector.multi_reduction <add>, %14, %cst [0] : vector<10x256xf32> to vector<256xf32>
    %16 = vector.shape_cast %15 : vector<256xf32> to vector<1x256xf32>
    %17 = arith.mulf %11, %11 : vector<10x256xf32>
    %cst_3 = arith.constant dense<0.000000e+00> : vector<256xf32>
    %18 = vector.multi_reduction <add>, %17, %cst_3 [0] : vector<10x256xf32> to vector<256xf32>
    %19 = vector.shape_cast %18 : vector<256xf32> to vector<1x256xf32>
    %20 = arith.mulf %13, %13 : vector<10x256xf32>
    %cst_4 = arith.constant dense<0.000000e+00> : vector<256xf32>
    %21 = vector.multi_reduction <add>, %20, %cst_4 [0] : vector<10x256xf32> to vector<256xf32>
    %22 = vector.shape_cast %21 : vector<256xf32> to vector<1x256xf32>
    %23 = arith.mulf %9, %11 : vector<10x256xf32>
    %cst_5 = arith.constant dense<0.000000e+00> : vector<256xf32>
    %24 = vector.multi_reduction <add>, %23, %cst_5 [0] : vector<10x256xf32> to vector<256xf32>
    %25 = vector.shape_cast %24 : vector<256xf32> to vector<1x256xf32>
    %26 = arith.mulf %9, %13 : vector<10x256xf32>
    %cst_6 = arith.constant dense<0.000000e+00> : vector<256xf32>
    %27 = vector.multi_reduction <add>, %26, %cst_6 [0] : vector<10x256xf32> to vector<256xf32>
    %28 = vector.shape_cast %27 : vector<256xf32> to vector<1x256xf32>
    %29 = arith.mulf %11, %13 : vector<10x256xf32>
    %cst_7 = arith.constant dense<0.000000e+00> : vector<256xf32>
    %30 = vector.multi_reduction <add>, %29, %cst_7 [0] : vector<10x256xf32> to vector<256xf32>
    %31 = vector.shape_cast %30 : vector<256xf32> to vector<1x256xf32>
    %32 = arith.mulf %16, %19 : vector<1x256xf32>
    %33 = arith.mulf %32, %22 : vector<1x256xf32>
    %34 = arith.mulf %25, %28 : vector<1x256xf32>
    %35 = arith.mulf %34, %31 : vector<1x256xf32>
    %36 = arith.mulf %25, %25 : vector<1x256xf32>
    %37 = arith.mulf %36, %22 : vector<1x256xf32>
    %38 = arith.mulf %28, %28 : vector<1x256xf32>
    %39 = arith.mulf %38, %19 : vector<1x256xf32>
    %40 = arith.addf %37, %39 : vector<1x256xf32>
    %41 = arith.mulf %31, %31 : vector<1x256xf32>
    %42 = arith.mulf %41, %16 : vector<1x256xf32>
    %43 = arith.addf %40, %42 : vector<1x256xf32>
    %cst_8 = arith.constant 1.00000298 : f32
    %44 = vector.broadcast %cst_8 : f32 to vector<1x256xf32>
    %45 = arith.mulf %44, %33 : vector<1x256xf32>
    %cst_9 = arith.constant 2.000000e+00 : f32
    %46 = vector.broadcast %cst_9 : f32 to vector<1x256xf32>
    %47 = arith.mulf %46, %35 : vector<1x256xf32>
    %48 = arith.addf %45, %47 : vector<1x256xf32>
    %cst_10 = arith.constant 1.00000095 : f32
    %49 = vector.broadcast %cst_10 : f32 to vector<1x256xf32>
    %50 = arith.mulf %49, %43 : vector<1x256xf32>
    %51 = arith.subf %48, %50 : vector<1x256xf32>
    %52 = math.log %51 : vector<1x256xf32>
    %53 = math.log %33 : vector<1x256xf32>
    %54 = arith.subf %52, %53 : vector<1x256xf32>
    %c0_11 = arith.constant 0 : index
    %c0_12 = arith.constant 0 : index
    %55 = vector.load %arg3[%c0_11, %c0_12] : memref<1x256xf32, #tpu.memory_space<vmem>>, vector<1x256xf32>
    tpu.vector_store %arg3[%c0_11, %c0_12], %54 {strides = array<i32>} : memref<1x256xf32, #tpu.memory_space<vmem>>, vector<1x256xf32>,
    return
  }
  func.func @transform_0(%arg0: i32) -> (i32, i32) {
    %c0_i32 = arith.constant 0 : i32
    %c0_i32_0 = arith.constant 0 : i32
    return %arg0, %c0_i32 : i32, i32
  }
  func.func @transform_1(%arg0: i32) -> (i32, i32) {
    %c0_i32 = arith.constant 0 : i32
    %c0_i32_0 = arith.constant 0 : i32
    return %c0_i32, %arg0 : i32, i32
  }
  func.func @transform_2(%arg0: i32) -> (i32, i32) {
    %c0_i32 = arith.constant 0 : i32
    %c0_i32_0 = arith.constant 0 : i32
    return %c0_i32, %arg0 : i32, i32
  }
}

</mosaic_0001>

<bundles_post_ra>
// kernel: tpu_custom_call.1
= control target key start
LH: loop header
LB: loop body
LE: loop exit
PB: predicated region body
PF: predicated region fallthrough
CT: control target
= control target key end

     0   :  { %7 = vsyncpa [#allocation3], 0  ;;  %s715_s0 = inlined_call_operand.hbm [shape: f32[8,30], index: 0, kind: input, shape index: {}]   ;;  %s716_s1 = inlined_call_operand.vmem [shape: s32[1,8], index: 1, kind: input, shape index: {}]   ;;  %s717_s2 = inlined_call_operand.hbm [shape: f32[1,8], index: 2, kind: output, shape index: {}]  }
   0x1   :  { %8 = vsyncpa [#allocation4], 0 }
   0x2   :  { %13 = vsyncadd [#allocation3], 3968  ;;  %s533_s9 = smov [#allocation2]   ;;  %s485_s13 = scalar_lea.hbm %s715_s0, 128 }
   0x3   :  { %s14_s10 = sshll.u32 %s533_s9, 4  ;;  %p486_p0 = scmp.ne.s32.totalorder %s715_s0, %s485_s13  ;;  %s15_s10 = int_to_ptr.vmem [resolvable:$true] %s14_s10 }
   0x4   :  { %p489_p1 = scmp.lt.u32.totalorder %s485_s13, %s715_s0 }
   0x6   :  { %p491_p2 = pnand %p489_p1, %p486_p0 }
   0x8   :  { %494 = shalt.err (!%p491_p2)
}
   0x9   :  { %s495_s18 = scalar_lea.vmem %s15_s10, 128  ;;  %s499_s19 = scalar_lea.vmem %s15_s10, 4096 }
   0xa   :  { %p496_p3 = scmp.ne.s32.totalorder %s15_s10, %s495_s18  ;;  %p500_p4 = scmp.lt.s32.totalorder %s15_s10, %s15_s10 }
   0xb   :  { %p501_p5 = scmp.lt.s32.totalorder %s499_s19, %s495_s18 }
   0xd   :  { %p502_p6 = por %p501_p5, %p500_p4 }
   0xf   :  { %p503_p7 = pnand %p502_p6, %p496_p3 }
  0x11   :  { %506 = shalt.err (!%p503_p7)
}
  0x12   :  { %s534_s20 = smov 128   ;;  %s535_s21 = smov 8  }
  0x13   :  { %20 = dma.hbm_to_vmem [thread:$0]  %s715_s0, 128, %s15_s10, [#allocation3], %s534_s20, %s534_s20, %s535_s21  }
  0x14   :  { %529 = dma.done.wait [#allocation3], 4096  }
  0x15   :  { %530 = vsyncadd [#allocation3], 4294963200  ;;  %v42_v0 = vld [vmem:[#allocation2 + $0x80] sm:$0xff]  ;;  %v43_v2 = vld [vmem:[#allocation2 + $0x88] sm:$0xff]  ;;  %v123_v32 = vlaneseq  ;;  %v536_v40 = vmov 0.0   ;;  %vm154_vm4 = vcmask 1041408  }
  0x16   :  { %v26_v1 = vld [vmem:[#allocation2] sm:$0xff]  ;;  %90 = vxpose.xlu1.b32.start [1/16] (narrow) %v42_v0, 32  ;;  %v27_v3 = vld [vmem:[#allocation2 + $0x8] sm:$0xff]  ;;  %v44_v4 = vld [vmem:[#allocation2 + $0x90] sm:$0xff]  ;;  %vm212_vm5 = vcmask 1045504   ;;  %vm169_vm6 = vcmask 1043456  }
  0x17   :  { %58 = vxpose.xlu0.b32.start [1/16] (narrow) %v26_v1, 32  ;;  %v28_v5 = vld [vmem:[#allocation2 + $0x10] sm:$0xff]  ;;  %v45_v6 = vld [vmem:[#allocation2 + $0x98] sm:$0xff]  ;;  %v46_v8 = vld [vmem:[#allocation2 + $0xa0] sm:$0xff]  ;;  %v567_v33 = vshrl.u32 %v123_v32, 7  ;;  %vm449_vm7 = vcmp.lt.s32.totalorder %v123_v32, 256 }
  0x18   :  { %v29_v7 = vld [vmem:[#allocation2 + $0x18] sm:$0xff]  ;;  %v30_v9 = vld [vmem:[#allocation2 + $0x20] sm:$0xff]  ;;  %v47_v10 = vld [vmem:[#allocation2 + $0xa8] sm:$0xff] }
  0x19   :  { %v31_v11 = vld [vmem:[#allocation2 + $0x28] sm:$0xff]  ;;  %v48_v12 = vld [vmem:[#allocation2 + $0xb0] sm:$0xff]  ;;  %v49_v14 = vld [vmem:[#allocation2 + $0xb8] sm:$0xff]  ;;  %v132_v34 = vsub.s32 1, %v567_v33  ;;  %v128_v36 = vsub.s32 0, %v567_v33  ;;  %v125_v37 = vadd.s32 8, %v567_v33 }
  0x1a   :  { %91 = vxpose.xlu1.b32.cont [2/16] (narrow) %v43_v2, 32  ;;  %v32_v13 = vld [vmem:[#allocation2 + $0x30] sm:$0xff]  ;;  %v33_v15 = vld [vmem:[#allocation2 + $0x38] sm:$0xff]  ;;  %v50_v16 = vld [vmem:[#allocation2 + $0xc0] sm:$0xff] }
  0x1b   :  { %59 = vxpose.xlu0.b32.cont [2/16] (narrow) %v27_v3, 32  ;;  %v34_v17 = vld [vmem:[#allocation2 + $0x40] sm:$0xff]  ;;  %v51_v18 = vld [vmem:[#allocation2 + $0xc8] sm:$0xff]  ;;  %v52_v20 = vld [vmem:[#allocation2 + $0xd0] sm:$0xff] }
  0x1c   :  { %v35_v19 = vld [vmem:[#allocation2 + $0x48] sm:$0xff]  ;;  %v36_v21 = vld [vmem:[#allocation2 + $0x50] sm:$0xff]  ;;  %v53_v22 = vld [vmem:[#allocation2 + $0xd8] sm:$0xff] }
  0x1d   :  { %v37_v23 = vld [vmem:[#allocation2 + $0x58] sm:$0xff]  ;;  %v54_v24 = vld [vmem:[#allocation2 + $0xe0] sm:$0xff]  ;;  %v55_v26 = vld [vmem:[#allocation2 + $0xe8] sm:$0xff] }
  0x1e   :  { %92 = vxpose.xlu1.b32.cont [3/16] (narrow) %v44_v4, 32  ;;  %v38_v25 = vld [vmem:[#allocation2 + $0x60] sm:$0xff]  ;;  %v39_v27 = vld [vmem:[#allocation2 + $0x68] sm:$0xff]  ;;  %v56_v28 = vld [vmem:[#allocation2 + $0xf0] sm:$0xff] }
  0x1f   :  { %60 = vxpose.xlu0.b32.cont [3/16] (narrow) %v28_v5, 32  ;;  %v40_v29 = vld [vmem:[#allocation2 + $0x70] sm:$0xff]  ;;  %v57_v30 = vld [vmem:[#allocation2 + $0xf8] sm:$0xff]  ;;  %v122_v35 = vld [vmem:[%s716_s1] sm:$0x3] }
  0x20   :  { %v41_v31 = vld [vmem:[#allocation2 + $0x78] sm:$0xff]  ;;  %v133_v38 = vrot.slane %v122_v35, %v132_v34  ;;  %v129_v39 = vrot.slane %v122_v35, %v128_v36 }
  0x22   :  { %93 = vxpose.xlu1.b32.cont [4/16] (narrow) %v45_v6, 32  ;;  %vm137_vm0 = vcmp.ne.s32.totalorder %v125_v37, %v133_v38  ;;  %vm135_vm1 = vcmp.ne.s32.totalorder %v567_v33, %v133_v38  ;;  %vm136_vm2 = vcmp.ne.s32.totalorder %v125_v37, %v129_v39  ;;  %vm134_vm3 = vcmp.ne.s32.totalorder %v567_v33, %v129_v39 }
  0x23   :  { %61 = vxpose.xlu0.b32.cont [4/16] (narrow) %v29_v7, 32  ;;  %v576_v41 = vsel %vm137_vm0, 1.0, %v536_v40  ;;  %v578_v42 = vsel %vm135_vm1, 1.0, %v536_v40  ;;  %v582_v46 = vsel %vm136_vm2, 1.0, %v536_v40  ;;  %v585_v48 = vsel %vm134_vm3, 1.0, %v536_v40 }
  0x24   :  { %v156_v45 = vrot.slane %v578_v42, 6  ;;  %v159_v47 = vrot.slane %v576_v41, 6  ;;  %v157_v50 = vrot.slane %v582_v46, 6  ;;  %v155_v57 = vrot.slane %v585_v48, 6 }
  0x25   :  { %v171_v6 = vrot.slane %v578_v42, 4  ;;  %v170_v35 = vrot.slane %v585_v48, 4 }
  0x26   :  { %94 = vxpose.xlu1.b32.cont [5/16] (narrow) %v46_v8, 32  ;;  %v160_v58 = vsel %vm154_vm4, %v156_v45, %v159_v47  ;;  %v158_v62 = vsel %vm154_vm4, %v155_v57, %v157_v50 }
  0x27   :  { %62 = vxpose.xlu0.b32.cont [5/16] (narrow) %v30_v9, 32 }
  0x2a   :  { %95 = vxpose.xlu1.b32.cont [6/16] (narrow) %v47_v10, 32 }
  0x2b   :  { %63 = vxpose.xlu0.b32.cont [6/16] (narrow) %v31_v11, 32 }
  0x2e   :  { %96 = vxpose.xlu1.b32.cont [7/16] (narrow) %v48_v12, 32 }
  0x2f   :  { %64 = vxpose.xlu0.b32.cont [7/16] (narrow) %v32_v13, 32 }
  0x32   :  { %97 = vxpose.xlu1.b32.cont [8/16] (narrow) %v49_v14, 32 }
  0x33   :  { %65 = vxpose.xlu0.b32.cont [8/16] (narrow) %v33_v15, 32 }
  0x36   :  { %98 = vxpose.xlu1.b32.cont [9/16] (narrow) %v50_v16, 32 }
  0x37   :  { %66 = vxpose.xlu0.b32.cont [9/16] (narrow) %v34_v17, 32 }
  0x3a   :  { %99 = vxpose.xlu1.b32.cont [10/16] (narrow) %v51_v18, 32 }
  0x3b   :  { %67 = vxpose.xlu0.b32.cont [10/16] (narrow) %v35_v19, 32 }
  0x3e   :  { %100 = vxpose.xlu1.b32.cont [11/16] (narrow) %v52_v20, 32  ;;  %v174_v20 = vrot.slane %v576_v41, 4 }
  0x3f   :  { %68 = vxpose.xlu0.b32.cont [11/16] (narrow) %v36_v21, 32 }
  0x42   :  { %101 = vxpose.xlu1.b32.cont [12/16] (narrow) %v53_v22, 32 }
  0x43   :  { %69 = vxpose.xlu0.b32.cont [12/16] (narrow) %v37_v23, 32 }
  0x46   :  { %102 = vxpose.xlu1.b32.cont [13/16] (narrow) %v54_v24, 32 }
  0x47   :  { %70 = vxpose.xlu0.b32.cont [13/16] (narrow) %v38_v25, 32 }
  0x4a   :  { %103 = vxpose.xlu1.b32.cont [14/16] (narrow) %v55_v26, 32 }
  0x4b   :  { %71 = vxpose.xlu0.b32.cont [14/16] (narrow) %v39_v27, 32 }
  0x4e   :  { %104 = vxpose.xlu1.b32.cont [15/16] (narrow) %v56_v28, 32  ;;  %v172_v28 = vrot.slane %v582_v46, 4 }
  0x4f   :  { %72 = vxpose.xlu0.b32.cont [15/16] (narrow) %v40_v29, 32 }
  0x52   :  { %105 = vxpose.xlu1.b32.end [16/16] (narrow) %v57_v30, 32 }
  0x53   :  { %73 = vxpose.xlu0.b32.end [16/16] (narrow) %v41_v31, 32 }
  0x96   :  { %v106_v43 = vpop.trf.xlu1 }
  0x97   :  { %v74_v44 = vpop.trf.xlu0  ;;  %v597_v55 = vmul.f32 %v578_v42, %v106_v43  ;;  %v173_v43 = vsel %vm169_vm6, %v170_v35, %v172_v28 }
  0x98   :  { %v600_v56 = vmul.f32 %v585_v48, %v74_v44 }
  0x99   :  { %v185_v4 = vmul.f32 %v597_v55, %v597_v55 }
  0x9a   :  { %v107_v49 = vpop.trf.xlu1  ;;  %v184_v5 = vmul.f32 %v600_v56, %v600_v56 }
  0x9b   :  { %v75_v51 = vpop.trf.xlu0  ;;  %v589_v52 = vmul.f32 %v576_v41, %v107_v49  ;;  %v591_v53 = vmul.f32 %v156_v45, %v107_v49  ;;  %v175_v41 = vsel %vm169_vm6, %v171_v6, %v174_v20 }
  0x9c   :  { %v594_v54 = vmul.f32 %v582_v46, %v75_v51  ;;  %v626_v12 = vmul.f32 %v155_v57, %v75_v51 }
  0x9d   :  { %v187_v59 = vmul.f32 %v589_v52, %v589_v52  ;;  %v205_v1 = vmul.f32 %v591_v53, %v591_v53  ;;  %v280_v7 = vrot.slane %v591_v53, 2 }
  0x9e   :  { %v186_v60 = vmul.f32 %v594_v54, %v594_v54  ;;  %v108_v61 = vpop.trf.xlu1  ;;  %v204_v29 = vmul.f32 %v626_v12, %v626_v12  ;;  %v277_v36 = vrot.slane %v626_v12, 2 }
  0x9f   :  { %v76_v63 = vpop.trf.xlu0  ;;  %v196_v0 = vsel %vm154_vm4, %v187_v59, 0.0  ;;  %v613_v3 = vmul.f32 %v160_v58, %v108_v61  ;;  %v216_v14 = vrot.slane %v205_v1, 2  ;;  %v630_v18 = vmul.f32 %v171_v6, %v108_v61 }
  0xa0   :  { %v188_v2 = vsel %vm154_vm4, %v186_v60, 0.0  ;;  %v624_v10 = vmul.f32 %v158_v62, %v76_v63  ;;  %v197_v11 = vadd.f32 %v196_v0, %v185_v4  ;;  %v213_v44 = vrot.slane %v204_v29, 2 }
  0xa1   :  { %v207_v8 = vmul.f32 %v613_v3, %v613_v3  ;;  %v281_v9 = vrot.slane %v613_v3, 2  ;;  %v189_v13 = vadd.f32 %v188_v2, %v184_v5  ;;  %v240_v37 = vmul.f32 %v630_v18, %v630_v18 }
  0xa2   :  { %v206_v24 = vmul.f32 %v624_v10, %v624_v10  ;;  %v198_v25 = vrot.slane %v197_v11, 4  ;;  %v278_v31 = vrot.slane %v624_v10, 2  ;;  %v109_v42 = vpop.trf.xlu1  ;;  %v314_v50 = vrot.slane %v630_v18, 4 }
  0xa3   :  { %v217_v15 = vrot.slane %v207_v8, 2  ;;  %v282_v16 = vsel %vm212_vm5, %v280_v7, %v281_v9  ;;  %v290_v17 = vmul.f32 %v281_v9, %v589_v52  ;;  %v190_v26 = vrot.slane %v189_v13, 4  ;;  %v77_v48 = vpop.trf.xlu0 }
  0xa4   :  { %v288_v19 = vmul.f32 %v282_v16, %v597_v55  ;;  %v214_v38 = vrot.slane %v206_v24, 2  ;;  %v199_v39 = vadd.f32 %v198_v25, %v197_v11  ;;  %v279_v46 = vsel %vm212_vm5, %v277_v36, %v278_v31 }
  0xa5   :  { %v218_v21 = vsel %vm212_vm5, %v216_v14, %v217_v15  ;;  %v231_v22 = vsel %vm154_vm4, %v217_v15, 0.0  ;;  %v299_v23 = vsel %vm154_vm4, %v290_v17, 0.0  ;;  %v647_v40 = vadd.f32 %v190_v26, %v189_v13 }
  0xa6   :  { %v232_v27 = vadd.f32 %v231_v22, %v218_v21  ;;  %v300_v30 = vadd.f32 %v299_v23, %v288_v19  ;;  %v289_v47 = vmul.f32 %v278_v31, %v594_v54  ;;  %v344_v51 = vrot.slane %v630_v18, 2 }
  0xa7   :  { %v655_v57 = vmul.f32 %v170_v35, %v76_v63  ;;  %v250_v58 = vrot.slane %v240_v37, 4  ;;  %v215_v59 = vsel %vm212_vm5, %v213_v44, %v214_v38  ;;  %v223_v60 = vsel %vm154_vm4, %v214_v38, 0.0 }
  0xa8   :  { %v233_v34 = vrot.slane %v232_v27, 4  ;;  %v301_v45 = vrot.slane %v300_v30, 4  ;;  %v183_v61 = vmul.f32 %v175_v41, %v109_v42  ;;  %v200_v62 = vrot.slane %v199_v39, 2 }
  0xa9   :  { %v192_v0 = vrot.slane %v647_v40, 2  ;;  %v287_v1 = vmul.f32 %v279_v46, %v600_v56  ;;  %v661_v2 = vmul.f32 %v173_v43, %v77_v48  ;;  %v291_v5 = vsel %vm154_vm4, %v289_v47, 0.0 }
  0xaa   :  { %v234_v49 = vadd.f32 %v233_v34, %v232_v27  ;;  %v302_v4 = vadd.f32 %v301_v45, %v300_v30  ;;  %v242_v6 = vmul.f32 %v183_v61, %v183_v61  ;;  %v315_v7 = vrot.slane %v183_v61, 4 }
  0xab   :  { %v224_v8 = vadd.f32 %v223_v60, %v215_v59  ;;  %v239_v9 = vmul.f32 %v655_v57, %v655_v57  ;;  %v311_v11 = vrot.slane %v655_v57, 4  ;;  %v345_v16 = vrot.slane %v183_v61, 2 }
  0xac   :  { %v235_v63 = vrot.slane %v234_v49, 2  ;;  %v251_v13 = vrot.slane %v242_v6, 4  ;;  %v316_v14 = vsel %vm169_vm6, %v314_v50, %v315_v7  ;;  %v324_v15 = vmul.f32 %v315_v7, %v589_v52 }
  0xad   :  { %v669_v17 = vadd.f32 %v200_v62, %v199_v39  ;;  %v292_v18 = vadd.f32 %v291_v5, %v287_v1  ;;  %v322_v19 = vmul.f32 %v316_v14, %v597_v55  ;;  %v241_v20 = vmul.f32 %v661_v2, %v661_v2 }
  0xae   :  { %v303_v21 = vrot.slane %v302_v4, 2  ;;  %v252_v22 = vsel %vm169_vm6, %v250_v58, %v251_v13  ;;  %v265_v23 = vsel %vm154_vm4, %v251_v13, 0.0  ;;  %v333_v24 = vsel %vm154_vm4, %v324_v15, 0.0 }
  0xaf   :  { %v225_v25 = vrot.slane %v224_v8, 4  ;;  %v247_v26 = vrot.slane %v239_v9, 4  ;;  %v341_v52 = vrot.slane %v655_v57, 2  ;;  %v266_v27 = vadd.f32 %v265_v23, %v252_v22 }
  0xb0   :  { %v236_v28 = vadd.f32 %v235_v63, %v234_v49  ;;  %v334_v29 = vadd.f32 %v333_v24, %v322_v19  ;;  %v346_v30 = vsel %vm212_vm5, %v344_v51, %v345_v16  ;;  %v354_v55 = vmul.f32 %v345_v16, %v613_v3 }
  0xb1   :  { %v293_v31 = vrot.slane %v292_v18, 4  ;;  %v267_v34 = vrot.slane %v266_v27, 4  ;;  %v352_v35 = vmul.f32 %v346_v30, %v591_v53  ;;  %v248_v36 = vrot.slane %v241_v20, 4 }
  0xb2   :  { %v304_v37 = vadd.f32 %v303_v21, %v302_v4  ;;  %v335_v38 = vrot.slane %v334_v29, 4  ;;  %v363_v39 = vrot.slane %v354_v55, 2  ;;  %v312_v41 = vrot.slane %v661_v2, 4 }
  0xb3   :  { %v226_v42 = vadd.f32 %v225_v25, %v224_v8  ;;  %v268_v43 = vadd.f32 %v267_v34, %v266_v27  ;;  %v362_v44 = vrot.slane %v352_v35, 2  ;;  %v249_v45 = vsel %vm169_vm6, %v247_v26, %v248_v36 }
  0xb4   :  { %v237_v46 = vrot.slane %v236_v28, 1  ;;  %v336_v47 = vadd.f32 %v335_v38, %v334_v29  ;;  %v377_v48 = vsel %vm154_vm4, %v363_v39, 0.0  ;;  %v257_v3 = vsel %vm154_vm4, %v248_v36, 0.0 }
  0xb5   :  { %v294_v49 = vadd.f32 %v293_v31, %v292_v18  ;;  %v269_v50 = vrot.slane %v268_v43, 2  ;;  %v364_v53 = vsel %vm212_vm5, %v362_v44, %v363_v39  ;;  %v258_v51 = vadd.f32 %v257_v3, %v249_v45 }
  0xb6   :  { %v337_v57 = vrot.slane %v336_v47, 2  ;;  %v378_v58 = vadd.f32 %v377_v48, %v364_v53  ;;  %v313_v59 = vsel %vm169_vm6, %v311_v11, %v312_v41  ;;  %v323_v60 = vmul.f32 %v312_v41, %v594_v54 }
  0xb7   :  { %v305_v61 = vrot.slane %v304_v37, 1  ;;  %v270_v62 = vadd.f32 %v269_v50, %v268_v43  ;;  %v259_v1 = vrot.slane %v258_v51, 4  ;;  %v321_v4 = vmul.f32 %v313_v59, %v600_v56 }
  0xb8   :  { %v338_v5 = vadd.f32 %v337_v57, %v336_v47  ;;  %v379_v6 = vrot.slane %v378_v58, 4  ;;  %v325_v7 = vsel %vm154_vm4, %v323_v60, 0.0  ;;  %v342_v63 = vrot.slane %v661_v2, 2 }
  0xb9   :  { %v295_v8 = vrot.slane %v294_v49, 2  ;;  %v271_v9 = vrot.slane %v270_v62, 1  ;;  %v260_v13 = vadd.f32 %v259_v1, %v258_v51  ;;  %v326_v14 = vadd.f32 %v325_v7, %v321_v4 }
  0xba   :  { %v339_v15 = vrot.slane %v338_v5, 1  ;;  %v380_v16 = vadd.f32 %v379_v6, %v378_v58  ;;  %v343_v11 = vsel %vm212_vm5, %v341_v52, %v342_v63  ;;  %v353_v54 = vmul.f32 %v342_v63, %v624_v10 }
  0xbb   :  { %v306_v18 = vadd.f32 %v305_v61, %v304_v37  ;;  %v227_v19 = vrot.slane %v226_v42, 2  ;;  %v327_v20 = vrot.slane %v326_v14, 4  ;;  %v351_v56 = vmul.f32 %v343_v11, %v626_v12 }
  0xbc   :  { %v202_v21 = vrot.slane %v669_v17, 1  ;;  %v340_v22 = vadd.f32 %v339_v15, %v338_v5  ;;  %v381_v23 = vrot.slane %v380_v16, 2  ;;  %v360_v2 = vrot.slane %v353_v54, 2 }
  0xbd   :  { %v238_v24 = vadd.f32 %v237_v46, %v236_v28  ;;  %v296_v25 = vadd.f32 %v295_v8, %v294_v49  ;;  %v261_v26 = vrot.slane %v260_v13, 2  ;;  %v328_v27 = vadd.f32 %v327_v20, %v326_v14 }
  0xbe   :  { %v272_v29 = vadd.f32 %v271_v9, %v270_v62  ;;  %v382_v30 = vadd.f32 %v381_v23, %v380_v16  ;;  %v398_v55 = vmul.f32 %v340_v22, %v340_v22  ;;  %v359_v52 = vrot.slane %v351_v56, 2 }
  0xbf   :  { %v193_v10 = vadd.f32 %v192_v0, %v647_v40  ;;  %v228_v31 = vadd.f32 %v227_v19, %v226_v42  ;;  %v394_v34 = vmul.f32 %v306_v18, %v306_v18  ;;  %v329_v12 = vrot.slane %v328_v27, 2 }
  0xc0   :  { %v383_v35 = vrot.slane %v382_v30, 1  ;;  %v400_v36 = vmul.f32 %v398_v55, %v238_v24  ;;  %v361_v37 = vsel %vm212_vm5, %v359_v52, %v360_v2  ;;  %v369_v28 = vsel %vm154_vm4, %v360_v2, 0.0 }
  0xc1   :  { %v390_v38 = vmul.f32 %v340_v22, %v306_v18  ;;  %v262_v39 = vadd.f32 %v261_v26, %v260_v13  ;;  %v330_v41 = vadd.f32 %v329_v12, %v328_v27  ;;  %v370_v43 = vadd.f32 %v369_v28, %v361_v37 }
  0xc2   :  { %v203_v44 = vadd.f32 %v202_v21, %v669_v17  ;;  %v297_v45 = vrot.slane %v296_v25, 1  ;;  %v384_v46 = vadd.f32 %v383_v35, %v382_v30  ;;  %v396_v47 = vmul.f32 %v394_v34, %v272_v29 }
  0xc3   :  { %v331_v48 = vrot.slane %v330_v41, 1  ;;  %v371_v40 = vrot.slane %v370_v43, 4  ;;  %v229_v42 = vrot.slane %v228_v31, 1  ;;  %v263_v53 = vrot.slane %v262_v39, 1 }
  0xc4   :  { %v386_v0 = vmul.f32 %v238_v24, %v203_v44  ;;  %v402_v3 = vadd.f32 %v400_v36, %v396_v47  ;;  %v404_v49 = vmul.f32 %v384_v46, %v384_v46  ;;  %v392_v50 = vmul.f32 %v390_v38, %v384_v46 }
  0xc5   :  { %v332_v51 = vadd.f32 %v331_v48, %v330_v41  ;;  %v372_v57 = vadd.f32 %v371_v40, %v370_v43  ;;  %v194_v58 = vrot.slane %v193_v10, 1  ;;  %v298_v59 = vadd.f32 %v297_v45, %v296_v25 }
  0xc6   :  { %v388_v60 = vmul.f32 %v386_v0, %v272_v29  ;;  %v406_v61 = vmul.f32 %v404_v49, %v203_v44  ;;  %v230_v17 = vadd.f32 %v229_v42, %v228_v31  ;;  %v412_v5 = vmul.f32 2.0, %v392_v50 }
  0xc7   :  { %v373_v62 = vrot.slane %v372_v57, 2  ;;  %v397_v1 = vmul.f32 %v332_v51, %v332_v51  ;;  %v264_v6 = vadd.f32 %v263_v53, %v262_v39  ;;  %v195_v63 = vadd.f32 %v194_v58, %v193_v10 }
  0xc8   :  { %v408_v4 = vadd.f32 %v406_v61, %v402_v3  ;;  %v410_v8 = vmul.f32 1.000003, %v388_v60  ;;  %v393_v9 = vmul.f32 %v298_v59, %v298_v59  ;;  %v389_v15 = vmul.f32 %v332_v51, %v298_v59 }
  0xc9   :  { %v374_v7 = vadd.f32 %v373_v62, %v372_v57  ;;  %v399_v16 = vmul.f32 %v397_v1, %v230_v17  ;;  %v385_v11 = vmul.f32 %v230_v17, %v195_v63  ;;  %v537_v52 = vmov 1966171168  }
  0xca   :  { %v416_v13 = vmul.f32 1.000001, %v408_v4  ;;  %v414_v54 = vadd.f32 %v412_v5, %v410_v8  ;;  %v395_v19 = vmul.f32 %v393_v9, %v264_v6  ;;  %v433_v10 = vunpack.c.l.s4 %v537_v52 }
  0xcb   :  { %v375_v14 = vrot.slane %v374_v7, 1  ;;  %v387_v20 = vmul.f32 %v385_v11, %v264_v6 }
  0xcc   :  { %v418_v56 = vsub.f32 %v414_v54, %v416_v13  ;;  %v401_v22 = vadd.f32 %v399_v16, %v395_v19  ;;  %v434_v36 = vunpack.c.0.s8 %v433_v10 }
  0xcd   :  { %v376_v18 = vadd.f32 %v375_v14, %v374_v7  ;;  %v409_v26 = vmul.f32 1.000003, %v387_v20 }
  0xce   :  { %477 = vlog2.f32 %v418_v56  ;;  %v437_v41 = vsub.s32 %v434_v36, %v567_v33 }
  0xcf   :  { %v391_v21 = vmul.f32 %v389_v15, %v376_v18  ;;  %v403_v23 = vmul.f32 %v376_v18, %v376_v18  ;;  %479 = vlog2.f32 %v388_v60 }
  0xd0   :  { %481 = vlog2.f32 %v387_v20 }
  0xd1   :  { %v405_v2 = vmul.f32 %v403_v23, %v195_v63  ;;  %v411_v24 = vmul.f32 2.0, %v391_v21 }
  0xd3   :  { %v407_v25 = vadd.f32 %v405_v2, %v401_v22  ;;  %v413_v27 = vadd.f32 %v411_v24, %v409_v26 }
  0xd5   :  { %v415_v29 = vmul.f32 1.000001, %v407_v25 }
  0xd7   :  { %v417_v30 = vsub.f32 %v413_v27, %v415_v29 }
  0xd8   :  { %v478_v55 = vpop.eup %477 }
  0xd9   :  { %483 = vlog2.f32 %v417_v30  ;;  %v480_v31 = vpop.eup %479  ;;  %v422_v34 = vmul.f32 0.6931472, %v478_v55 }
  0xda   :  { %v482_v12 = vpop.eup %481  ;;  %v426_v35 = vmul.f32 0.6931472, %v480_v31 }
  0xdb   :  { %v424_v39 = vmul.f32 0.6931472, %v482_v12 }
  0xdc   :  { %v428_v28 = vsub.f32 %v422_v34, %v426_v35 }
  0xe3   :  { %v484_v37 = vpop.eup %483 }
  0xe4   :  { %v420_v38 = vmul.f32 0.6931472, %v484_v37 }
  0xe6   :  { %v427_v43 = vsub.f32 %v420_v38, %v424_v39 }
  0xe8   :  { %v431_v44 = vcombine.low %v427_v43, %v428_v28 }
  0xea   :  { %v438_v45 = vrot.slane %v431_v44, %v437_v41 }
  0xec   :  { %v445_v46 = vrot.slane %v438_v45, %v437_v41 }
  0xee   :  { %451 = vst.msk [vmem:[#allocation5] sm:$0x3] %vm449_vm7, %v445_v46 }
  0xef   :  { %456 = vsyncadd [#allocation4], 16  ;;  %s538_s1 = smov [#allocation5]  }
  0xf0   :  { %s458_s25 = sshll.u32 %s538_s1, 4  ;;  %s459_s25 = int_to_ptr.vmem [resolvable:$true] %s458_s25 }
  0xf1   :  { %s507_s26 = scalar_lea.vmem %s459_s25, 16  ;;  %s511_s27 = scalar_lea.vmem %s459_s25, 32 }
  0xf2   :  { %p508_p8 = scmp.ne.s32.totalorder %s459_s25, %s507_s26  ;;  %p512_p9 = scmp.lt.s32.totalorder %s459_s25, %s459_s25 }
  0xf3   :  { %p513_p10 = scmp.lt.s32.totalorder %s511_s27, %s507_s26 }
  0xf5   :  { %p514_p11 = por %p513_p10, %p512_p9 }
  0xf7   :  { %p515_p12 = pnand %p514_p11, %p508_p8 }
  0xf9   :  { %518 = shalt.err (!%p515_p12)
}
  0xfa   :  { %s519_s30 = scalar_lea.hbm %s717_s2, 16 }
  0xfb   :  { %p520_p13 = scmp.ne.s32.totalorder %s717_s2, %s519_s30  ;;  %p523_p0 = scmp.lt.u32.totalorder %s519_s30, %s717_s2 }
  0xfd   :  { %p525_p1 = pnand %p523_p0, %p520_p13 }
  0xff   :  { %528 = shalt.err (!%p525_p1)
}
 0x100   :  { %461 = dma.vmem_to_hbm [thread:$0]  %s459_s25, 16, %s717_s2, [#allocation4]  }
 0x101   :  { %531 = dma.done.wait [#allocation4], 32  }
 0x102   :  { %532 = vsyncadd [#allocation4], 4294967264 }
 0x103   :  { %465 = vsyncpa [#allocation3], 1 }
 0x104   :  { %466 = vsyncpa [#allocation4], 1 }

</bundles_post_ra>
